<compile_context>
chip_gen: v6e
topology: v6e:2x2x1
jax: 0.10.0
libtpu: 0.0.40
codegen_flags: <defaults>
</compile_context>

<pallas_src>
import jax
import jax.numpy as jnp
from jax.experimental import pallas as pl
from jax.experimental.pallas import tpu as pltpu


def ms_cam_kernel(x_ref, wA_ref, bA_ref, wB_ref, bB_ref, o_ref):
    # x_ref block: (Bb, C, HW) — Bb batch elements, spatial flattened so the
    # lane dim (HW) is the full trailing extent -> lane-dense loads/stores.
    Bb = x_ref.shape[0]

    # Tiny packed weights/biases, loaded once and reused across the Bb images.
    w1 = wA_ref[0]          # (inter, C)
    w3 = wA_ref[1]          # (inter, C)
    w2 = wB_ref[0]          # (C, inter)
    w4 = wB_ref[1]          # (C, inter)
    b1 = bA_ref[0]          # (inter, 1)
    b3 = bA_ref[1]          # (inter, 1)
    b2 = bB_ref[0]          # (C, 1)
    b4 = bB_ref[1]          # (C, 1)

    for bi in range(Bb):    # static unrolled loop (Bb is small, capped at 8)
        xi = x_ref[bi]                                               # (C, HW) f32

        # ---- local branch: per-pixel 1x1-conv MLP over channels (MXU) ----
        h = jnp.dot(w1, xi, preferred_element_type=jnp.float32) + b1
        h = jnp.maximum(h, 0.0)                                      # (inter, HW)
        xl = jnp.dot(w2, h, preferred_element_type=jnp.float32) + b2  # (C, HW)

        # ---- global branch: GAP + same MLP, computed on VPU/XLU (N=1, no MXU) ----
        pooled = jnp.mean(xi, axis=1, keepdims=True)                 # (C, 1)
        hg = jnp.sum(w3 * pooled.T, axis=1, keepdims=True) + b3      # (inter, 1)
        hg = jnp.maximum(hg, 0.0)
        xg = jnp.sum(w4 * hg.T, axis=1, keepdims=True) + b4          # (C, 1)

        # ---- gate and re-weight ----
        wei = jax.nn.sigmoid(xl + xg)                                # (C, HW)
        o_ref[bi] = (xi * wei).astype(o_ref.dtype)


def _vmem_capacity_bytes(default=64 << 20):
    try:
        info = pltpu.get_tpu_info()
        return int(getattr(info, "vmem_capacity_bytes", default))
    except Exception:
        return default


def ms_cam(x, params):
    """Pallas MS_CAM forward. x: (B, C, H, W) f32.  params = (w1,b1,w2,b2,w3,b3,w4,b4),
    weights in PyTorch Conv2d (out, in) order with the trailing 1x1 dims squeezed."""
    w1, b1, w2, b2, w3, b3, w4, b4 = params
    B, C, H, W = x.shape
    HW = H * W
    inter = w1.shape[0]
    itemsize = x.dtype.itemsize

    # Free layout change: flatten spatial dims into the lane axis.
    x2 = x.reshape(B, C, HW)

    # Pack the 8 tiny weight/bias operands into 4 arrays (fewer specs / DMAs).
    wA = jnp.stack([w1, w3])                      # (2, inter, C)
    wB = jnp.stack([w2, w4])                      # (2, C, inter)
    bA = jnp.stack([b1, b3]).reshape(2, inter, 1)  # (2, inter, 1)
    bB = jnp.stack([b2, b4]).reshape(2, C, 1)      # (2, C, 1)

    # --- Block sizing from VMEM capacity (v5e/v6e: 128 MiB, v7x: 64 MiB) ---
    vmem_cap = _vmem_capacity_bytes()
    per_image = C * HW * itemsize
    block_budget = vmem_cap // 2                  # in+out double buffers <= half VMEM
    bb_vmem = max(1, block_budget // (4 * per_image))
    Bb = max(1, min(B, bb_vmem, 8))               # cap the static unroll
    while B % Bb:                                 # round down to a divisor of B
        Bb -= 1

    weights_bytes = sum(a.size * a.dtype.itemsize for a in (wA, wB, bA, bB))
    needed = 4 * Bb * per_image + 2 * weights_bytes + (8 << 20)   # headroom
    vmem_limit = int(min(max(needed, 32 << 20), (vmem_cap * 5) // 8))

    out = pl.pallas_call(
        ms_cam_kernel,
        out_shape=jax.ShapeDtypeStruct((B, C, HW), x.dtype),
        grid=(B // Bb,),
        in_specs=[
            pl.BlockSpec((Bb, C, HW), lambda b: (b, 0, 0)),
            pl.BlockSpec((2, inter, C), lambda b: (0, 0, 0)),
            pl.BlockSpec((2, inter, 1), lambda b: (0, 0, 0)),
            pl.BlockSpec((2, C, inter), lambda b: (0, 0, 0)),
            pl.BlockSpec((2, C, 1), lambda b: (0, 0, 0)),
        ],
        out_specs=pl.BlockSpec((Bb, C, HW), lambda b: (b, 0, 0)),
        compiler_params=pltpu.CompilerParams(
            dimension_semantics=("parallel",),
            vmem_limit_bytes=vmem_limit,
        ),
    )(x2, wA, bA, wB, bB)

    return out.reshape(B, C, H, W)


def ms_cam_ref(x, params):
    """Pure-JAX reference mirroring the PyTorch MS_CAM forward exactly."""
    w1, b1, w2, b2, w3, b3, w4, b4 = params
    xl = jnp.einsum('oc,bchw->bohw', w1, x) + b1[None, :, None, None]
    xl = jax.nn.relu(xl)
    xl = jnp.einsum('oc,bchw->bohw', w2, xl) + b2[None, :, None, None]

    pooled = jnp.mean(x, axis=(2, 3))                                 # (B, C)
    xg = pooled @ w3.T + b3[None, :]
    xg = jax.nn.relu(xg)
    xg = xg @ w4.T + b4[None, :]

    wei = jax.nn.sigmoid(xl + xg[:, :, None, None])
    return x * wei


if __name__ == "__main__":
    key = jax.random.PRNGKey(0)
    B, C, H, W, r = 2, 64, 16, 16, 4          # module defaults: channels=64, r=4
    inter = C // r
    keys = jax.random.split(key, 9)
    s = 0.2
    x = jax.random.normal(keys[0], (B, C, H, W), dtype=jnp.float32)
    w1 = jax.random.normal(keys[1], (inter, C), jnp.float32) * s
    b1 = jax.random.normal(keys[2], (inter,), jnp.float32) * s
    w2 = jax.random.normal(keys[3], (C, inter), jnp.float32) * s
    b2 = jax.random.normal(keys[4], (C,), jnp.float32) * s
    w3 = jax.random.normal(keys[5], (inter, C), jnp.float32) * s
    b3 = jax.random.normal(keys[6], (inter,), jnp.float32) * s
    w4 = jax.random.normal(keys[7], (C, inter), jnp.float32) * s
    b4 = jax.random.normal(keys[8], (C,), jnp.float32) * s
    params = (w1, b1, w2, b2, w3, b3, w4, b4)

    out = jax.jit(ms_cam)(x, params)
    jax.block_until_ready(out)

    ref = ms_cam_ref(x, params)
    assert out.shape == (B, C, H, W)
    assert jnp.allclose(out, ref, atol=1e-5, rtol=1e-5), float(jnp.max(jnp.abs(out - ref)))
    print("KERNEL_OK")
</pallas_src>

<mosaic_0001>
module attributes {stable_mosaic.version = 11 : i64} {
  func.func @ms_cam_kernel(%arg0: i32, %arg1: memref<2x64x256xf32, #tpu.memory_space<vmem>>, %arg2: memref<2x16x64xf32, #tpu.memory_space<vmem>>, %arg3: memref<2x16x1xf32, #tpu.memory_space<vmem>>, %arg4: memref<2x64x16xf32, #tpu.memory_space<vmem>>, %arg5: memref<2x64x1xf32, #tpu.memory_space<vmem>>, %arg6: memref<2x64x256xf32, #tpu.memory_space<vmem>>) attributes {dimension_semantics = [#tpu.dimension_semantics<parallel>], iteration_bounds = array<i64: 1>, scalar_prefetch = 0 : i64, scratch_operands = 0 : i64, tpu.core_type = #tpu.core_type<tc>, window_params = [{transform_indices = @transform_0, window_bounds = array<i64: 2, 64, 256>}, {pipeline_mode = #tpu.pipeline_mode<synchronous>, transform_indices = @transform_1, window_bounds = array<i64: 2, 16, 64>}, {pipeline_mode = #tpu.pipeline_mode<synchronous>, transform_indices = @transform_2, window_bounds = array<i64: 2, 16, 1>}, {pipeline_mode = #tpu.pipeline_mode<synchronous>, transform_indices = @transform_3, window_bounds = array<i64: 2, 64, 16>}, {pipeline_mode = #tpu.pipeline_mode<synchronous>, transform_indices = @transform_4, window_bounds = array<i64: 2, 64, 1>}, {transform_indices = @transform_5, window_bounds = array<i64: 2, 64, 256>}]} {
    %c0 = arith.constant 0 : index
    %c0_0 = arith.constant 0 : index
    %c0_1 = arith.constant 0 : index
    %0 = vector.load %arg2[%c0, %c0_0, %c0_1] : memref<2x16x64xf32, #tpu.memory_space<vmem>>, vector<1x16x64xf32>
    %1 = vector.shape_cast %0 : vector<1x16x64xf32> to vector<16x64xf32>
    %c1 = arith.constant 1 : index
    %c0_2 = arith.constant 0 : index
    %c0_3 = arith.constant 0 : index
    %2 = vector.load %arg2[%c1, %c0_2, %c0_3] : memref<2x16x64xf32, #tpu.memory_space<vmem>>, vector<1x16x64xf32>
    %3 = vector.shape_cast %2 : vector<1x16x64xf32> to vector<16x64xf32>
    %c0_4 = arith.constant 0 : index
    %c0_5 = arith.constant 0 : index
    %c0_6 = arith.constant 0 : index
    %4 = vector.load %arg4[%c0_4, %c0_5, %c0_6] : memref<2x64x16xf32, #tpu.memory_space<vmem>>, vector<1x64x16xf32>
    %5 = vector.shape_cast %4 : vector<1x64x16xf32> to vector<64x16xf32>
    %c1_7 = arith.constant 1 : index
    %c0_8 = arith.constant 0 : index
    %c0_9 = arith.constant 0 : index
    %6 = vector.load %arg4[%c1_7, %c0_8, %c0_9] : memref<2x64x16xf32, #tpu.memory_space<vmem>>, vector<1x64x16xf32>
    %7 = vector.shape_cast %6 : vector<1x64x16xf32> to vector<64x16xf32>
    %c0_10 = arith.constant 0 : index
    %c0_11 = arith.constant 0 : index
    %c0_12 = arith.constant 0 : index
    %8 = vector.load %arg3[%c0_10, %c0_11, %c0_12] : memref<2x16x1xf32, #tpu.memory_space<vmem>>, vector<1x16x1xf32>
    %9 = vector.shape_cast %8 : vector<1x16x1xf32> to vector<16x1xf32>
    %c1_13 = arith.constant 1 : index
    %c0_14 = arith.constant 0 : index
    %c0_15 = arith.constant 0 : index
    %10 = vector.load %arg3[%c1_13, %c0_14, %c0_15] : memref<2x16x1xf32, #tpu.memory_space<vmem>>, vector<1x16x1xf32>
    %11 = vector.shape_cast %10 : vector<1x16x1xf32> to vector<16x1xf32>
    %c0_16 = arith.constant 0 : index
    %c0_17 = arith.constant 0 : index
    %c0_18 = arith.constant 0 : index
    %12 = vector.load %arg5[%c0_16, %c0_17, %c0_18] : memref<2x64x1xf32, #tpu.memory_space<vmem>>, vector<1x64x1xf32>
    %13 = vector.shape_cast %12 : vector<1x64x1xf32> to vector<64x1xf32>
    %c1_19 = arith.constant 1 : index
    %c0_20 = arith.constant 0 : index
    %c0_21 = arith.constant 0 : index
    %14 = vector.load %arg5[%c1_19, %c0_20, %c0_21] : memref<2x64x1xf32, #tpu.memory_space<vmem>>, vector<1x64x1xf32>
    %15 = vector.shape_cast %14 : vector<1x64x1xf32> to vector<64x1xf32>
    %c0_22 = arith.constant 0 : index
    %c0_23 = arith.constant 0 : index
    %c0_24 = arith.constant 0 : index
    %16 = vector.load %arg1[%c0_22, %c0_23, %c0_24] : memref<2x64x256xf32, #tpu.memory_space<vmem>>, vector<1x64x256xf32>
    %17 = vector.shape_cast %16 : vector<1x64x256xf32> to vector<64x256xf32>
    %cst = arith.constant dense<0.000000e+00> : vector<16x256xf32>
    %18 = tpu.matmul %1, %17, %cst {dimension_numbers = #tpu.dot_dimension_numbers<[1], [0], [0], [1], [0, 0, 1, 1], [], []>} : vector<16x64xf32>, vector<64x256xf32>, vector<16x256xf32> -> vector<16x256xf32>
    %19 = vector.broadcast %9 : vector<16x1xf32> to vector<16x256xf32>
    %20 = arith.addf %18, %19 : vector<16x256xf32>
    %cst_25 = arith.constant 0.000000e+00 : f32
    %21 = vector.broadcast %cst_25 : f32 to vector<16x256xf32>
    %22 = arith.maximumf %20, %21 : vector<16x256xf32>
    %cst_26 = arith.constant dense<0.000000e+00> : vector<64x256xf32>
    %23 = tpu.matmul %5, %22, %cst_26 {dimension_numbers = #tpu.dot_dimension_numbers<[1], [0], [0], [1], [0, 0, 1, 1], [], []>} : vector<64x16xf32>, vector<16x256xf32>, vector<64x256xf32> -> vector<64x256xf32>
    %24 = vector.broadcast %13 : vector<64x1xf32> to vector<64x256xf32>
    %25 = arith.addf %23, %24 : vector<64x256xf32>
    %cst_27 = arith.constant dense<0.000000e+00> : vector<64xf32>
    %26 = vector.multi_reduction <add>, %17, %cst_27 [1] : vector<64x256xf32> to vector<64xf32>
    %27 = vector.shape_cast %26 : vector<64xf32> to vector<64x1xf32>
    %cst_28 = arith.constant 2.560000e+02 : f32
    %28 = vector.broadcast %cst_28 : f32 to vector<64x1xf32>
    %29 = arith.divf %27, %28 : vector<64x1xf32>
    %30 = tpu.transpose %29, [1, 0] : vector<64x1xf32> -> vector<1x64xf32>
    %31 = vector.broadcast %30 : vector<1x64xf32> to vector<16x64xf32>
    %32 = arith.mulf %3, %31 : vector<16x64xf32>
    %cst_29 = arith.constant dense<0.000000e+00> : vector<16xf32>
    %33 = vector.multi_reduction <add>, %32, %cst_29 [1] : vector<16x64xf32> to vector<16xf32>
    %34 = vector.shape_cast %33 : vector<16xf32> to vector<16x1xf32>
    %35 = arith.addf %34, %11 : vector<16x1xf32>
    %cst_30 = arith.constant 0.000000e+00 : f32
    %36 = vector.broadcast %cst_30 : f32 to vector<16x1xf32>
    %37 = arith.maximumf %35, %36 : vector<16x1xf32>
    %38 = tpu.transpose %37, [1, 0] : vector<16x1xf32> -> vector<1x16xf32>
    %39 = vector.broadcast %38 : vector<1x16xf32> to vector<64x16xf32>
    %40 = arith.mulf %7, %39 : vector<64x16xf32>
    %cst_31 = arith.constant dense<0.000000e+00> : vector<64xf32>
    %41 = vector.multi_reduction <add>, %40, %cst_31 [1] : vector<64x16xf32> to vector<64xf32>
    %42 = vector.shape_cast %41 : vector<64xf32> to vector<64x1xf32>
    %43 = arith.addf %42, %15 : vector<64x1xf32>
    %44 = vector.broadcast %43 : vector<64x1xf32> to vector<64x256xf32>
    %45 = arith.addf %25, %44 : vector<64x256xf32>
    %46 = arith.negf %45 : vector<64x256xf32>
    %47 = math.exp %46 : vector<64x256xf32>
    %cst_32 = arith.constant 1.000000e+00 : f32
    %48 = vector.broadcast %cst_32 : f32 to vector<64x256xf32>
    %49 = arith.addf %48, %47 : vector<64x256xf32>
    %50 = arith.divf %48, %49 : vector<64x256xf32>
    %51 = arith.mulf %17, %50 : vector<64x256xf32>
    %c0_33 = arith.constant 0 : index
    %c0_34 = arith.constant 0 : index
    %c0_35 = arith.constant 0 : index
    %52 = vector.load %arg6[%c0_33, %c0_34, %c0_35] : memref<2x64x256xf32, #tpu.memory_space<vmem>>, vector<1x64x256xf32>
    %53 = vector.shape_cast %52 : vector<1x64x256xf32> to vector<64x256xf32>
    %54 = vector.shape_cast %51 : vector<64x256xf32> to vector<1x64x256xf32>
    tpu.vector_store %arg6[%c0_33, %c0_34, %c0_35], %54 {strides = array<i32>} : memref<2x64x256xf32, #tpu.memory_space<vmem>>, vector<1x64x256xf32>,
    %c1_36 = arith.constant 1 : index
    %c0_37 = arith.constant 0 : index
    %c0_38 = arith.constant 0 : index
    %55 = vector.load %arg1[%c1_36, %c0_37, %c0_38] : memref<2x64x256xf32, #tpu.memory_space<vmem>>, vector<1x64x256xf32>
    %56 = vector.shape_cast %55 : vector<1x64x256xf32> to vector<64x256xf32>
    %cst_39 = arith.constant dense<0.000000e+00> : vector<16x256xf32>
    %57 = tpu.matmul %1, %56, %cst_39 {dimension_numbers = #tpu.dot_dimension_numbers<[1], [0], [0], [1], [0, 0, 1, 1], [], []>} : vector<16x64xf32>, vector<64x256xf32>, vector<16x256xf32> -> vector<16x256xf32>
    %58 = vector.broadcast %9 : vector<16x1xf32> to vector<16x256xf32>
    %59 = arith.addf %57, %58 : vector<16x256xf32>
    %cst_40 = arith.constant 0.000000e+00 : f32
    %60 = vector.broadcast %cst_40 : f32 to vector<16x256xf32>
    %61 = arith.maximumf %59, %60 : vector<16x256xf32>
    %cst_41 = arith.constant dense<0.000000e+00> : vector<64x256xf32>
    %62 = tpu.matmul %5, %61, %cst_41 {dimension_numbers = #tpu.dot_dimension_numbers<[1], [0], [0], [1], [0, 0, 1, 1], [], []>} : vector<64x16xf32>, vector<16x256xf32>, vector<64x256xf32> -> vector<64x256xf32>
    %63 = vector.broadcast %13 : vector<64x1xf32> to vector<64x256xf32>
    %64 = arith.addf %62, %63 : vector<64x256xf32>
    %cst_42 = arith.constant dense<0.000000e+00> : vector<64xf32>
    %65 = vector.multi_reduction <add>, %56, %cst_42 [1] : vector<64x256xf32> to vector<64xf32>
    %66 = vector.shape_cast %65 : vector<64xf32> to vector<64x1xf32>
    %cst_43 = arith.constant 2.560000e+02 : f32
    %67 = vector.broadcast %cst_43 : f32 to vector<64x1xf32>
    %68 = arith.divf %66, %67 : vector<64x1xf32>
    %69 = tpu.transpose %68, [1, 0] : vector<64x1xf32> -> vector<1x64xf32>
    %70 = vector.broadcast %69 : vector<1x64xf32> to vector<16x64xf32>
    %71 = arith.mulf %3, %70 : vector<16x64xf32>
    %cst_44 = arith.constant dense<0.000000e+00> : vector<16xf32>
    %72 = vector.multi_reduction <add>, %71, %cst_44 [1] : vector<16x64xf32> to vector<16xf32>
    %73 = vector.shape_cast %72 : vector<16xf32> to vector<16x1xf32>
    %74 = arith.addf %73, %11 : vector<16x1xf32>
    %cst_45 = arith.constant 0.000000e+00 : f32
    %75 = vector.broadcast %cst_45 : f32 to vector<16x1xf32>
    %76 = arith.maximumf %74, %75 : vector<16x1xf32>
    %77 = tpu.transpose %76, [1, 0] : vector<16x1xf32> -> vector<1x16xf32>
    %78 = vector.broadcast %77 : vector<1x16xf32> to vector<64x16xf32>
    %79 = arith.mulf %7, %78 : vector<64x16xf32>
    %cst_46 = arith.constant dense<0.000000e+00> : vector<64xf32>
    %80 = vector.multi_reduction <add>, %79, %cst_46 [1] : vector<64x16xf32> to vector<64xf32>
    %81 = vector.shape_cast %80 : vector<64xf32> to vector<64x1xf32>
    %82 = arith.addf %81, %15 : vector<64x1xf32>
    %83 = vector.broadcast %82 : vector<64x1xf32> to vector<64x256xf32>
    %84 = arith.addf %64, %83 : vector<64x256xf32>
    %85 = arith.negf %84 : vector<64x256xf32>
    %86 = math.exp %85 : vector<64x256xf32>
    %cst_47 = arith.constant 1.000000e+00 : f32
    %87 = vector.broadcast %cst_47 : f32 to vector<64x256xf32>
    %88 = arith.addf %87, %86 : vector<64x256xf32>
    %89 = arith.divf %87, %88 : vector<64x256xf32>
    %90 = arith.mulf %56, %89 : vector<64x256xf32>
    %c1_48 = arith.constant 1 : index
    %c0_49 = arith.constant 0 : index
    %c0_50 = arith.constant 0 : index
    %91 = vector.load %arg6[%c1_48, %c0_49, %c0_50] : memref<2x64x256xf32, #tpu.memory_space<vmem>>, vector<1x64x256xf32>
    %92 = vector.shape_cast %91 : vector<1x64x256xf32> to vector<64x256xf32>
    %93 = vector.shape_cast %90 : vector<64x256xf32> to vector<1x64x256xf32>
    tpu.vector_store %arg6[%c1_48, %c0_49, %c0_50], %93 {strides = array<i32>} : memref<2x64x256xf32, #tpu.memory_space<vmem>>, vector<1x64x256xf32>,
    return
  }
  func.func @transform_0(%arg0: i32) -> (i32, i32, i32) {
    %c0_i32 = arith.constant 0 : i32
    %c0_i32_0 = arith.constant 0 : i32
    %c0_i32_1 = arith.constant 0 : i32
    return %arg0, %c0_i32, %c0_i32_0 : i32, i32, i32
  }
  func.func @transform_1(%arg0: i32) -> (i32, i32, i32) {
    %c0_i32 = arith.constant 0 : i32
    %c0_i32_0 = arith.constant 0 : i32
    %c0_i32_1 = arith.constant 0 : i32
    %c0_i32_2 = arith.constant 0 : i32
    return %c0_i32, %c0_i32_0, %c0_i32_1 : i32, i32, i32
  }
  func.func @transform_2(%arg0: i32) -> (i32, i32, i32) {
    %c0_i32 = arith.constant 0 : i32
    %c0_i32_0 = arith.constant 0 : i32
    %c0_i32_1 = arith.constant 0 : i32
    %c0_i32_2 = arith.constant 0 : i32
    return %c0_i32, %c0_i32_0, %c0_i32_1 : i32, i32, i32
  }
  func.func @transform_3(%arg0: i32) -> (i32, i32, i32) {
    %c0_i32 = arith.constant 0 : i32
    %c0_i32_0 = arith.constant 0 : i32
    %c0_i32_1 = arith.constant 0 : i32
    %c0_i32_2 = arith.constant 0 : i32
    return %c0_i32, %c0_i32_0, %c0_i32_1 : i32, i32, i32
  }
  func.func @transform_4(%arg0: i32) -> (i32, i32, i32) {
    %c0_i32 = arith.constant 0 : i32
    %c0_i32_0 = arith.constant 0 : i32
    %c0_i32_1 = arith.constant 0 : i32
    %c0_i32_2 = arith.constant 0 : i32
    return %c0_i32, %c0_i32_0, %c0_i32_1 : i32, i32, i32
  }
  func.func @transform_5(%arg0: i32) -> (i32, i32, i32) {
    %c0_i32 = arith.constant 0 : i32
    %c0_i32_0 = arith.constant 0 : i32
    %c0_i32_1 = arith.constant 0 : i32
    return %arg0, %c0_i32, %c0_i32_0 : i32, i32, i32
  }
}

</mosaic_0001>

<bundles_post_ra>
// kernel: ms_cam.1
= control target key start
LH: loop header
LB: loop body
LE: loop exit
PB: predicated region body
PF: predicated region fallthrough
CT: control target
= control target key end

     0   :  { %v1525_v0 = vmov 0   ;;  %v1526_v9 = vmov 0.0   ;;  %vm90_vm0 = vcmask 523264   ;;  %vm218_vm1 = vcmask 130048   ;;  %s2292_s4 = inlined_call_operand.vmem [shape: f32[2,64,1], index: 4, kind: input, shape index: {}]   ;;  %s2293_s0 = inlined_call_operand.vmem [shape: f32[2,64,256], index: 0, kind: input, shape index: {}]   ;;  %s2294_s2 = inlined_call_operand.vmem [shape: f32[2,16,1], index: 2, kind: input, shape index: {}]   ;;  %s2295_s1 = inlined_call_operand.vmem [shape: f32[2,16,64], index: 1, kind: input, shape index: {}]   ;;  %s2296_s3 = inlined_call_operand.vmem [shape: f32[2,64,16], index: 3, kind: input, shape index: {}]   ;;  %s2297_s5 = inlined_call_operand.vmem [shape: f32[2,64,256], index: 5, kind: output, shape index: {}]  }
   0x1   :  { %1364 = vset.pattern.permute.xlu1 %v1525_v0  ;;  %v47_v1 = vld [vmem:[%s2292_s4] sm:$0xff]  ;;  %v1563_v2 = vld [vmem:[%s2293_s0 + $0x78] sm:$0xff]  ;;  %v1568_v3 = vld [vmem:[%s2293_s0 + $0x70] sm:$0xff]  ;;  %1363 = vset.pattern.permute.xlu0 %v1525_v0 }
   0x2   :  { %180 = vperm.xlu1 %1364, %v47_v1   ;;  %113 = vmatprep.subr.mxu0 %v1563_v2  ;;  %v1574_v4 = vld [vmem:[%s2293_s0 + $0x68] sm:$0xff]  ;;  %v1579_v5 = vld [vmem:[%s2293_s0 + $0x60] sm:$0xff]  ;;  %v1588_v7 = vld [vmem:[%s2293_s0 + $0x58] sm:$0xff]  ;;  %v377_v57 = vadd.f32 %v1563_v2, %v1568_v3 }
   0x3   :  { %114 = vmatpush1.msra.mxu0 %v1568_v3  ;;  %v48_v6 = vld [vmem:[%s2292_s4 + $0x8] sm:$0xff]  ;;  %161 = vmatprep.mubr.f32.mxu0 %v1526_v9  ;;  %v1598_v10 = vld [vmem:[%s2293_s0 + $0x50] sm:$0xff]  ;;  %v42_v12 = vld [vmem:[%s2294_s2] sm:$0xff]  ;;  %v374_v55 = vadd.f32 %v1574_v4, %v1579_v5 }
   0x4   :  { %v43_v8 = vld [vmem:[%s2294_s2 + $0x8] sm:$0xff]  ;;  %115 = vmatprep.subr.mxu0 %v1574_v4  ;;  %331 = vmatprep.mubr.f32.mxu1 %v1526_v9  ;;  %v72_v13 = vld [vmem:[%s2293_s0 + $0x40] sm:$0xff]  ;;  %v50_v14 = vld [vmem:[%s2292_s4 + $0x18] sm:$0xff]  ;;  %v371_v51 = vadd.f32 %v1588_v7, %v1598_v10 }
   0x5   :  { %87 = vperm.xlu0 %1363, %v43_v8   ;;  %116 = vmatpush1.msra.mxu0 %v1579_v5  ;;  %v1604_v11 = vld [vmem:[%s2293_s0 + $0x48] sm:$0xff]  ;;  %v71_v15 = vld [vmem:[%s2293_s0 + $0x38] sm:$0xff]  ;;  %v70_v16 = vld [vmem:[%s2293_s0 + $0x30] sm:$0xff] }
   0x6   :  { %185 = vperm.xlu1 %1364, %v48_v6   ;;  %117 = vmatprep.subr.mxu0 %v1588_v7  ;;  %v69_v17 = vld [vmem:[%s2293_s0 + $0x28] sm:$0xff]  ;;  %v68_v18 = vld [vmem:[%s2293_s0 + $0x20] sm:$0xff]  ;;  %v67_v20 = vld [vmem:[%s2293_s0 + $0x18] sm:$0xff]  ;;  %v365_v43 = vadd.f32 %v71_v15, %v70_v16  ;;  %v368_v47 = vadd.f32 %v1604_v11, %v72_v13 }
   0x7   :  { %118 = vmatpush1.msra.mxu0 %v1598_v10  ;;  %v52_v19 = vld [vmem:[%s2292_s4 + $0x28] sm:$0xff]  ;;  %v66_v21 = vld [vmem:[%s2293_s0 + $0x10] sm:$0xff]  ;;  %v64_v23 = vld [vmem:[%s2293_s0] sm:$0xff]  ;;  %v362_v39 = vadd.f32 %v69_v17, %v68_v18 }
   0x8   :  { %119 = vmatprep.subr.mxu0 %v1604_v11  ;;  %v65_v22 = vld [vmem:[%s2293_s0 + $0x8] sm:$0xff]  ;;  %v1649_v24 = vld [vmem:[%s2295_s1] sm:$0xff]  ;;  %v359_v27 = vadd.f32 %v67_v20, %v66_v21  ;;  %v1665_v28 = vld [vmem:[%s2293_s0 + $0x90] sm:$0xff] }
   0x9   :  { %82 = vperm.xlu0 %1363, %v42_v12   ;;  %120 = vmatpush1.msra.mxu0 %v72_v13  ;;  %v1657_v25 = vld [vmem:[%s2295_s1 + $0x8] sm:$0xff]  ;;  %v356_v26 = vadd.f32 %v65_v22, %v64_v23  ;;  %v1670_v29 = vld [vmem:[%s2293_s0 + $0x98] sm:$0xff]  ;;  %v1675_v30 = vld [vmem:[%s2293_s0 + $0x80] sm:$0xff] }
   0xa   :  { %195 = vperm.xlu1 %1364, %v50_v14   ;;  %121 = vmatprep.subr.mxu0 %v71_v15  ;;  %v1680_v31 = vld [vmem:[%s2293_s0 + $0x88] sm:$0xff]  ;;  %v911_v32 = vadd.f32 %v1670_v29, %v1665_v28  ;;  %v1687_v33 = vld [vmem:[%s2293_s0 + $0xa0] sm:$0xff]  ;;  %v1701_v37 = vld [vmem:[%s2293_s0 + $0xb0] sm:$0xff] }
   0xb   :  { %122 = vmatpush1.msra.mxu0 %v70_v16  ;;  %v1692_v34 = vld [vmem:[%s2293_s0 + $0xa8] sm:$0xff]  ;;  %v908_v35 = vadd.f32 %v1680_v31, %v1675_v30  ;;  %v1706_v38 = vld [vmem:[%s2293_s0 + $0xb8] sm:$0xff]  ;;  %v1713_v41 = vld [vmem:[%s2293_s0 + $0xc0] sm:$0xff] }
   0xc   :  { %123 = vmatprep.subr.mxu0 %v69_v17  ;;  %v914_v36 = vadd.f32 %v1692_v34, %v1687_v33  ;;  %v917_v40 = vadd.f32 %v1706_v38, %v1701_v37  ;;  %v1718_v42 = vld [vmem:[%s2293_s0 + $0xc8] sm:$0xff]  ;;  %v1725_v45 = vld [vmem:[%s2293_s0 + $0xd0] sm:$0xff]  ;;  %v1730_v46 = vld [vmem:[%s2293_s0 + $0xd8] sm:$0xff] }
   0xd   :  { %124 = vmatpush1.msra.mxu0 %v68_v18  ;;  %v920_v44 = vadd.f32 %v1718_v42, %v1713_v41  ;;  %v923_v48 = vadd.f32 %v1730_v46, %v1725_v45  ;;  %v1738_v49 = vld [vmem:[%s2293_s0 + $0xe0] sm:$0xff]  ;;  %v1743_v50 = vld [vmem:[%s2293_s0 + $0xe8] sm:$0xff]  ;;  %v1752_v53 = vld [vmem:[%s2293_s0 + $0xf0] sm:$0xff] }
   0xe   :  { %205 = vperm.xlu1 %1364, %v52_v19   ;;  %125 = vmatprep.subr.mxu0 %v67_v20  ;;  %v926_v52 = vadd.f32 %v1743_v50, %v1738_v49  ;;  %v1757_v54 = vld [vmem:[%s2293_s0 + $0xf8] sm:$0xff] }
   0xf   :  { %126 = vmatpush1.msra.mxu0 %v66_v21  ;;  %v929_v56 = vadd.f32 %v1757_v54, %v1752_v53 }
  0x10   :  { %127 = vmatprep.subr.mxu0 %v65_v22 }
  0x11   :  { %128 = vmatpush1.msra.mxu0 %v64_v23 }
  0x12   :  { %1273 = vmatmul.mubr.msk.f32.vlgmr.msra.gmra.mxu0 %vm90_vm0, %v1649_v24 }
  0x13   :  { %167 = vmatprep.mubr.f32.mxu0 %v1526_v9 }
  0x16   :  { %1274 = vmatmul.mubr.msk.f32.gmra.mxu0 %vm90_vm0, %v1657_v25 }
  0x17   :  { %307 = vmatprep.mubr.f32.mxu0 %v1526_v9 }
  0x28   :  { %357 = vadd.xlane.f32.xlu0 %v356_v26 }
  0x2c   :  { %360 = vadd.xlane.f32.xlu0 %v359_v27 }
  0x30   :  { %912 = vadd.xlane.f32.xlu0 %v911_v32 }
  0x32   :  { %909 = vadd.xlane.f32.xlu1 %v908_v35 }
  0x34   :  { %915 = vadd.xlane.f32.xlu0 %v914_v36 }
  0x36   :  { %363 = vadd.xlane.f32.xlu1 %v362_v39 }
  0x38   :  { %918 = vadd.xlane.f32.xlu0 %v917_v40 }
  0x3a   :  { %366 = vadd.xlane.f32.xlu1 %v365_v43 }
  0x3c   :  { %921 = vadd.xlane.f32.xlu0 %v920_v44 }
  0x3e   :  { %369 = vadd.xlane.f32.xlu1 %v368_v47 }
  0x40   :  { %924 = vadd.xlane.f32.xlu0 %v923_v48 }
  0x42   :  { %372 = vadd.xlane.f32.xlu1 %v371_v51 }
  0x44   :  { %927 = vadd.xlane.f32.xlu0 %v926_v52 }
  0x46   :  { %375 = vadd.xlane.f32.xlu1 %v374_v55 }
  0x48   :  { %930 = vadd.xlane.f32.xlu0 %v929_v56 }
  0x4a   :  { %378 = vadd.xlane.f32.xlu1 %v377_v57 }
  0x7d   :  { %v1765_v58 = vpop.permute.xlu1 %180 }
  0x80   :  { %v1767_v59 = vpop.permute.xlu0 %87 }
  0x81   :  { %v1769_v60 = vpop.permute.xlu1 %185 }
  0x84   :  { %v1771_v61 = vpop.permute.xlu0 %82 }
  0x85   :  { %v1773_v63 = vpop.permute.xlu1 %195 }
  0x89   :  { %v1775_v5 = vpop.permute.xlu1 %205 }
  0xb1   :  { %v358_v62 = vpop.xlane.xlu0 %357 }
  0xb2   :  { %v381_v0 = vmul.f32 0.00390625, %v358_v62 }
  0xb4   :  { %389 = vxpose.xlu1.b32.start [1/8] (short) (narrow) %v381_v0, 8 }
  0xb5   :  { %v361_v1 = vpop.xlane.xlu0 %360 }
  0xb6   :  { %v382_v4 = vmul.f32 0.00390625, %v361_v1 }
  0xb8   :  { %390 = vxpose.xlu1.b32.cont [2/8] (short) (narrow) %v382_v4, 8 }
  0xb9   :  { %v913_v2 = vpop.xlane.xlu0 %912 }
  0xba   :  { %v933_v8 = vmul.f32 0.00390625, %v913_v2 }
  0xbb   :  { %v910_v3 = vpop.xlane.xlu1 %909 }
  0xbc   :  { %v932_v6 = vmul.f32 0.00390625, %v910_v3  ;;  %v1784_v3 = vld [vmem:[%s2296_s3] sm:$0xff] }
  0xbd   :  { %v916_v7 = vpop.xlane.xlu0 %915 }
  0xbe   :  { %940 = vxpose.xlu0.b32.start [1/8] (short) (narrow) %v932_v6, 8  ;;  %v934_v13 = vmul.f32 0.00390625, %v916_v7  ;;  %v1789_v6 = vld [vmem:[%s2296_s3 + $0x20] sm:$0xff]  ;;  %v1800_v7 = vld [vmem:[%s2296_s3 + $0x28] sm:$0xff] }
  0xbf   :  { %v364_v10 = vpop.xlane.xlu1 %363 }
  0xc0   :  { %v383_v11 = vmul.f32 0.00390625, %v364_v10 }
  0xc1   :  { %v919_v12 = vpop.xlane.xlu0 %918 }
  0xc2   :  { %391 = vxpose.xlu1.b32.cont [3/8] (short) (narrow) %v383_v11, 8  ;;  %941 = vxpose.xlu0.b32.cont [2/8] (short) (narrow) %v933_v8, 8  ;;  %v935_v17 = vmul.f32 0.00390625, %v919_v12  ;;  %v1807_v8 = vld [vmem:[%s2296_s3 + $0x8] sm:$0xff] }
  0xc3   :  { %v367_v14 = vpop.xlane.xlu1 %366 }
  0xc4   :  { %v384_v15 = vmul.f32 0.00390625, %v367_v14 }
  0xc5   :  { %v922_v16 = vpop.xlane.xlu0 %921 }
  0xc6   :  { %392 = vxpose.xlu1.b32.cont [4/8] (short) (narrow) %v384_v15, 8  ;;  %942 = vxpose.xlu0.b32.cont [3/8] (short) (narrow) %v934_v13, 8  ;;  %v936_v21 = vmul.f32 0.00390625, %v922_v16 }
  0xc7   :  { %v370_v18 = vpop.xlane.xlu1 %369 }
  0xc8   :  { %v385_v19 = vmul.f32 0.00390625, %v370_v18 }
  0xc9   :  { %v925_v20 = vpop.xlane.xlu0 %924 }
  0xca   :  { %393 = vxpose.xlu1.b32.cont [5/8] (short) (narrow) %v385_v19, 8  ;;  %943 = vxpose.xlu0.b32.cont [4/8] (short) (narrow) %v935_v17, 8  ;;  %v937_v27 = vmul.f32 0.00390625, %v925_v20 }
  0xcb   :  { %v373_v22 = vpop.xlane.xlu1 %372 }
  0xcc   :  { %v386_v23 = vmul.f32 0.00390625, %v373_v22 }
  0xcd   :  { %v928_v26 = vpop.xlane.xlu0 %927 }
  0xce   :  { %394 = vxpose.xlu1.b32.cont [6/8] (short) (narrow) %v386_v23, 8  ;;  %944 = vxpose.xlu0.b32.cont [5/8] (short) (narrow) %v936_v21, 8  ;;  %v938_v39 = vmul.f32 0.00390625, %v928_v26 }
  0xcf   :  { %v376_v32 = vpop.xlane.xlu1 %375 }
  0xd0   :  { %v387_v35 = vmul.f32 0.00390625, %v376_v32 }
  0xd1   :  { %v931_v43 = vpop.xlane.xlu0 %930 }
  0xd2   :  { %395 = vxpose.xlu1.b32.cont [7/8] (short) (narrow) %v387_v35, 8  ;;  %v163_v36 = vpop.f32.mrf.mxu0  ;;  %945 = vxpose.xlu0.b32.cont [6/8] (short) (narrow) %v937_v27, 8  ;;  %v939_v51 = vmul.f32 0.00390625, %v931_v43 }
  0xd3   :  { %v379_v40 = vpop.xlane.xlu1 %378  ;;  %v164_v62 = vadd.f32 %v163_v36, %v1771_v61 }
  0xd4   :  { %v388_v44 = vmul.f32 0.00390625, %v379_v40  ;;  %v165_v47 = vpop.f32.mrf.mxu0 }
  0xd5   :  { %v166_v56 = vadd.f32 %v165_v47, %v1771_v61  ;;  %v174_v2 = vmax.f32 %v164_v62, 0.0  ;;  %v1263_v47 = vld [vmem:[%s2294_s2 + $0x10] sm:$0xff] }
  0xd6   :  { %396 = vxpose.xlu1.b32.end [8/8] (short) (narrow) %v388_v44, 8  ;;  %v169_v48 = vpop.f32.mrf.mxu0  ;;  %946 = vxpose.xlu0.b32.cont [7/8] (short) (narrow) %v938_v39, 8 }
  0xd7   :  { %v170_v52 = vadd.f32 %v169_v48, %v1767_v59  ;;  %v175_v4 = vmax.f32 %v166_v56, 0.0  ;;  %v1264_v48 = vld [vmem:[%s2294_s2 + $0x18] sm:$0xff] }
  0xd8   :  { %v171_v55 = vpop.f32.mrf.mxu0 }
  0xd9   :  { %v172_v57 = vadd.f32 %v171_v55, %v1767_v59  ;;  %v176_v1 = vmax.f32 %v170_v52, 0.0 }
  0xda   :  { %947 = vxpose.xlu0.b32.end [8/8] (short) (narrow) %v939_v51, 8 }
  0xdb   :  { %v177_v0 = vmax.f32 %v172_v57, 0.0 }
  0xdd   :  { %271 = vmatprep.subr.mxu0 %v177_v0  ;;  %1357 = vmatprep.subr.mxu1 %v177_v0 }
  0xde   :  { %272 = vmatpush1.msra.mxu0 %v176_v1  ;;  %1359 = vmatpush1.msra.mxu1 %v176_v1 }
  0xdf   :  { %273 = vmatprep.subr.mxu0 %v175_v4  ;;  %1358 = vmatprep.subr.mxu1 %v175_v4 }
  0xe0   :  { %274 = vmatpush1.msra.mxu0 %v174_v2  ;;  %1360 = vmatpush1.msra.mxu1 %v174_v2 }
  0xe1   :  { %1275 = vmatmul.mubr.msk.f32.vlgmr.msra.gmra.mxu0 %vm218_vm1, %v1784_v3  ;;  %1279 = vmatmul.mubr.msk.f32.vlgmr.msra.gmra.mxu1 %vm218_vm1, %v1789_v6 }
  0xe2   :  { %730 = vmatprep.subr.mxu0 %v1757_v54  ;;  %313 = vmatprep.mubr.f32.mxu0 %v1526_v9 }
  0xe3   :  { %731 = vmatpush1.msra.mxu0 %v1752_v53  ;;  %337 = vmatprep.mubr.f32.mxu1 %v1526_v9  ;;  %v1821_v53 = vld [vmem:[%s2296_s3 + $0x10] sm:$0xff] }
  0xe4   :  { %732 = vmatprep.subr.mxu0 %v1743_v50 }
  0xe5   :  { %733 = vmatpush1.msra.mxu0 %v1738_v49  ;;  %1280 = vmatmul.mubr.msk.f32.gmra.mxu1 %vm218_vm1, %v1800_v7  ;;  %v1872_v49 = vld [vmem:[%s2296_s3 + $0x38] sm:$0xff] }
  0xe6   :  { %1276 = vmatmul.mubr.msk.f32.gmra.mxu0 %vm218_vm1, %v1807_v8  ;;  %734 = vmatprep.subr.mxu0 %v1730_v46 }
  0xe7   :  { %735 = vmatpush1.msra.mxu0 %v1725_v45  ;;  %319 = vmatprep.mubr.f32.mxu0 %v1526_v9  ;;  %v1834_v45 = vld [vmem:[%s2296_s3 + $0x18] sm:$0xff] }
  0xe8   :  { %736 = vmatprep.subr.mxu0 %v1718_v42  ;;  %343 = vmatprep.mubr.f32.mxu1 %v1526_v9 }
  0xe9   :  { %737 = vmatpush1.msra.mxu0 %v1713_v41 }
  0xea   :  { %1277 = vmatmul.mubr.msk.f32.gmra.mxu0 %vm218_vm1, %v1821_v53  ;;  %738 = vmatprep.subr.mxu0 %v1706_v38 }
  0xeb   :  { %739 = vmatpush1.msra.mxu0 %v1701_v37  ;;  %325 = vmatprep.mubr.f32.mxu0 %v1526_v9 }
  0xec   :  { %740 = vmatprep.subr.mxu0 %v1692_v34 }
  0xed   :  { %741 = vmatpush1.msra.mxu0 %v1687_v33  ;;  %v421_v33 = vlaneseq }
  0xee   :  { %1278 = vmatmul.mubr.msk.f32.gmra.mxu0 %vm218_vm1, %v1834_v45  ;;  %742 = vmatprep.subr.mxu0 %v1670_v29 }
  0xef   :  { %743 = vmatpush1.msra.mxu0 %v1665_v28  ;;  %778 = vmatprep.mubr.f32.mxu0 %v1526_v9  ;;  %v422_v34 = vshrl.u32 %v421_v33, 7  ;;  %v1253_v28 = vld [vmem:[%s2295_s1 + $0x10] sm:$0xff] }
  0xf0   :  { %744 = vmatprep.subr.mxu0 %v1680_v31 }
  0xf1   :  { %745 = vmatpush1.msra.mxu0 %v1675_v30  ;;  %v1850_v37 = vsub.s32 0, %v422_v34  ;;  %v1862_v30 = vld [vmem:[%s2296_s3 + $0x30] sm:$0xff] }
  0xf2   :  { %1315 = vmatmul.mubr.msk.f32.vlgmr.msra.gmra.mxu0 %vm90_vm0, %v1649_v24  ;;  %v1254_v24 = vld [vmem:[%s2295_s1 + $0x18] sm:$0xff]  ;;  %1281 = vmatmul.mubr.msk.f32.gmra.mxu1 %vm218_vm1, %v1862_v30 }
  0xf3   :  { %784 = vmatprep.mubr.f32.mxu0 %v1526_v9  ;;  %349 = vmatprep.mubr.f32.mxu1 %v1526_v9 }
  0xf6   :  { %1316 = vmatmul.mubr.msk.f32.gmra.mxu0 %vm90_vm0, %v1657_v25  ;;  %1282 = vmatmul.mubr.msk.f32.gmra.mxu1 %vm218_vm1, %v1872_v49 }
  0xf7   :  { %859 = vmatprep.mubr.f32.mxu1 %v1526_v9 }
 0x136   :  { %v405_v29 = vpop.trf.xlu1 }
 0x137   :  { %v424_v31 = vrot.slane %v405_v29, %v1850_v37 }
 0x139   :  { %v425_v25 = vmul.f32 %v1253_v28, %v424_v31  ;;  %v426_v42 = vmul.f32 %v1254_v24, %v424_v31 }
 0x13a   :  { %v956_v38 = vpop.trf.xlu0 }
 0x13b   :  { %v427_v41 = vsel %vm90_vm0, %v425_v25, 0.0  ;;  %v975_v46 = vrot.slane %v956_v38, %v1850_v37  ;;  %v430_v10 = vsel %vm90_vm0, %v426_v42, 0.0 }
 0x13c   :  { %428 = vadd.xlane.f32.xlu0 %v427_v41 }
 0x13d   :  { %v976_v50 = vmul.f32 %v1253_v28, %v975_v46  ;;  %v977_v54 = vmul.f32 %v1254_v24, %v975_v46  ;;  %v1259_v24 = vld [vmem:[%s2296_s3 + $0x60] sm:$0xff] }
 0x13f   :  { %v978_v11 = vsel %vm90_vm0, %v976_v50, 0.0  ;;  %v981_v12 = vsel %vm90_vm0, %v977_v54, 0.0  ;;  %v1262_v50 = vld [vmem:[%s2296_s3 + $0x78] sm:$0xff] }
 0x140   :  { %431 = vadd.xlane.f32.xlu0 %v430_v10  ;;  %979 = vadd.xlane.f32.xlu1 %v978_v11 }
 0x144   :  { %982 = vadd.xlane.f32.xlu1 %v981_v12 }
 0x1a1   :  { %v1880_v13 = vpop.f32.mrf.mxu0 }
 0x1a3   :  { %v1882_v14 = vpop.f32.mrf.mxu0 }
 0x1a6   :  { %v1884_v15 = vpop.f32.mrf.mxu0 }
 0x1a8   :  { %v1886_v16 = vpop.f32.mrf.mxu0 }
 0x1aa   :  { %v1888_v17 = vpop.f32.mrf.mxu0 }
 0x1ac   :  { %v1890_v18 = vpop.f32.mrf.mxu0 }
 0x1ae   :  { %v1892_v19 = vpop.f32.mrf.mxu0 }
 0x1b0   :  { %v1894_v20 = vpop.f32.mrf.mxu0 }
 0x1b2   :  { %v780_v21 = vpop.f32.mrf.mxu0 }
 0x1b3   :  { %v781_v36 = vadd.f32 %v780_v21, %v1771_v61 }
 0x1b4   :  { %v782_v22 = vpop.f32.mrf.mxu0 }
 0x1b5   :  { %v783_v32 = vadd.f32 %v782_v22, %v1771_v61  ;;  %v791_v44 = vmax.f32 %v781_v36, 0.0 }
 0x1b6   :  { %v786_v23 = vpop.f32.mrf.mxu0 }
 0x1b7   :  { %v787_v26 = vadd.f32 %v786_v23, %v1767_v59  ;;  %v792_v43 = vmax.f32 %v783_v32, 0.0 }
 0x1b8   :  { %v788_v27 = vpop.f32.mrf.mxu0 }
 0x1b9   :  { %v789_v35 = vadd.f32 %v788_v27, %v1767_v59  ;;  %v793_v40 = vmax.f32 %v787_v26, 0.0 }
 0x1bb   :  { %v794_v39 = vmax.f32 %v789_v35, 0.0 }
 0x1bd   :  { %823 = vmatprep.subr.mxu1 %v794_v39 }
 0x1be   :  { %824 = vmatpush1.msra.mxu1 %v793_v40 }
 0x1bf   :  { %825 = vmatprep.subr.mxu1 %v792_v43 }
 0x1c0   :  { %826 = vmatpush1.msra.mxu1 %v791_v44 }
 0x1c1   :  { %1317 = vmatmul.mubr.msk.f32.vlgmr.msra.gmra.mxu1 %vm218_vm1, %v1784_v3 }
 0x1c2   :  { %865 = vmatprep.mubr.f32.mxu1 %v1526_v9 }
 0x1c5   :  { %1318 = vmatmul.mubr.msk.f32.gmra.mxu1 %vm218_vm1, %v1807_v8  ;;  %v429_v59 = vpop.xlane.xlu0 %428  ;;  %v1255_v8 = vld [vmem:[%s2296_s3 + $0x40] sm:$0xff] }
 0x1c6   :  { %v433_v61 = vadd.f32 %v1263_v47, %v429_v59  ;;  %871 = vmatprep.mubr.f32.mxu1 %v1526_v9 }
 0x1c8   :  { %v435_v51 = vmax.f32 %v433_v61, 0.0 }
 0x1c9   :  { %1319 = vmatmul.mubr.msk.f32.gmra.mxu1 %vm218_vm1, %v1821_v53  ;;  %v432_v52 = vpop.xlane.xlu0 %431  ;;  %v980_v55 = vpop.xlane.xlu1 %979  ;;  %v1258_v53 = vld [vmem:[%s2296_s3 + $0x58] sm:$0xff] }
 0x1ca   :  { %v434_v56 = vadd.f32 %v1264_v48, %v432_v52  ;;  %437 = vxpose.xlu1.b32.start [1/2] (short) (narrow) %v435_v51, 8  ;;  %877 = vmatprep.mubr.f32.mxu1 %v1526_v9  ;;  %v984_v57 = vadd.f32 %v1263_v47, %v980_v55  ;;  %v54_v55 = vld [vmem:[%s2292_s4 + $0x38] sm:$0xff] }
 0x1cc   :  { %v436_v62 = vmax.f32 %v434_v56, 0.0  ;;  %v986_v0 = vmax.f32 %v984_v57, 0.0  ;;  %v49_v56 = vld [vmem:[%s2292_s4 + $0x10] sm:$0xff]  ;;  %v51_v57 = vld [vmem:[%s2292_s4 + $0x20] sm:$0xff] }
 0x1cd   :  { %1320 = vmatmul.mubr.msk.f32.gmra.mxu1 %vm218_vm1, %v1834_v45  ;;  %v983_v1 = vpop.xlane.xlu1 %982 }
 0x1ce   :  { %438 = vxpose.xlu1.b32.end [2/2] (short) (narrow) %v436_v62, 8  ;;  %883 = vmatprep.mubr.f32.mxu1 %v1526_v9  ;;  %v985_v4 = vadd.f32 %v1264_v48, %v983_v1  ;;  %v53_v62 = vld [vmem:[%s2292_s4 + $0x30] sm:$0xff]  ;;  %v1265_v1 = vld [vmem:[%s2292_s4 + $0x40] sm:$0xff] }
 0x1cf   :  { %988 = vxpose.xlu0.b32.start [1/2] (short) (narrow) %v986_v0, 8  ;;  %v1266_v0 = vld [vmem:[%s2292_s4 + $0x48] sm:$0xff] }
 0x1d0   :  { %v987_v2 = vmax.f32 %v985_v4, 0.0 }
 0x1d1   :  { %1321 = vmatmul.mubr.msk.f32.gmra.mxu1 %vm218_vm1, %v1789_v6  ;;  %v1256_v6 = vld [vmem:[%s2296_s3 + $0x48] sm:$0xff] }
 0x1d2   :  { %889 = vmatprep.mubr.f32.mxu1 %v1526_v9 }
 0x1d3   :  { %989 = vxpose.xlu0.b32.end [2/2] (short) (narrow) %v987_v2, 8 }
 0x1d5   :  { %1322 = vmatmul.mubr.msk.f32.gmra.mxu1 %vm218_vm1, %v1800_v7 }
 0x1d6   :  { %895 = vmatprep.mubr.f32.mxu1 %v1526_v9 }
 0x1d9   :  { %1323 = vmatmul.mubr.msk.f32.gmra.mxu1 %vm218_vm1, %v1862_v30  ;;  %v1260_v30 = vld [vmem:[%s2296_s3 + $0x68] sm:$0xff] }
 0x1da   :  { %901 = vmatprep.mubr.f32.mxu1 %v1526_v9  ;;  %v1257_v9 = vld [vmem:[%s2296_s3 + $0x50] sm:$0xff] }
 0x1dd   :  { %1324 = vmatmul.mubr.msk.f32.gmra.mxu1 %vm218_vm1, %v1872_v49  ;;  %v1261_v49 = vld [vmem:[%s2296_s3 + $0x70] sm:$0xff] }
 0x246   :  { %v453_v3 = vpop.trf.xlu1 }
 0x247   :  { %v472_v7 = vrot.slane %v453_v3, %v1850_v37 }
 0x249   :  { %v474_v45 = vmul.f32 %v1256_v6, %v472_v7  ;;  %v473_v33 = vmul.f32 %v1255_v8, %v472_v7  ;;  %v476_v28 = vmul.f32 %v1258_v53, %v472_v7  ;;  %v475_v31 = vmul.f32 %v1257_v9, %v472_v7 }
 0x24a   :  { %v477_v42 = vmul.f32 %v1259_v24, %v472_v7  ;;  %v478_v46 = vmul.f32 %v1260_v30, %v472_v7  ;;  %v479_v12 = vmul.f32 %v1261_v49, %v472_v7  ;;  %v480_v21 = vmul.f32 %v1262_v50, %v472_v7 }
 0x24b   :  { %v484_v34 = vsel %vm218_vm1, %v474_v45, 0.0  ;;  %v481_v29 = vsel %vm218_vm1, %v473_v33, 0.0  ;;  %v1004_v25 = vpop.trf.xlu0  ;;  %v490_v38 = vsel %vm218_vm1, %v476_v28, 0.0  ;;  %v487_v41 = vsel %vm218_vm1, %v475_v31, 0.0  ;;  %v1268_v45 = vld [vmem:[%s2292_s4 + $0x58] sm:$0xff]  ;;  %v1269_v33 = vld [vmem:[%s2292_s4 + $0x60] sm:$0xff] }
 0x24c   :  { %485 = vadd.xlane.f32.xlu1 %v484_v34  ;;  %482 = vadd.xlane.f32.xlu0 %v481_v29  ;;  %v1023_v54 = vrot.slane %v1004_v25, %v1850_v37  ;;  %v493_v10 = vsel %vm218_vm1, %v477_v42, 0.0  ;;  %v496_v11 = vsel %vm218_vm1, %v478_v46, 0.0  ;;  %v499_v26 = vsel %vm218_vm1, %v479_v12, 0.0  ;;  %v1272_v46 = vld [vmem:[%s2292_s4 + $0x78] sm:$0xff] }
 0x24d   :  { %v502_v27 = vsel %vm218_vm1, %v480_v21, 0.0 }
 0x24e   :  { %v1025_v22 = vmul.f32 %v1256_v6, %v1023_v54  ;;  %v1024_v23 = vmul.f32 %v1255_v8, %v1023_v54  ;;  %v1027_v35 = vmul.f32 %v1258_v53, %v1023_v54  ;;  %v1026_v36 = vmul.f32 %v1257_v9, %v1023_v54  ;;  %v1267_v8 = vld [vmem:[%s2292_s4 + $0x50] sm:$0xff] }
 0x24f   :  { %v1029_v43 = vmul.f32 %v1260_v30, %v1023_v54  ;;  %v1028_v44 = vmul.f32 %v1259_v24, %v1023_v54  ;;  %v1031_v61 = vmul.f32 %v1262_v50, %v1023_v54  ;;  %v1030_v48 = vmul.f32 %v1261_v49, %v1023_v54  ;;  %v1270_v24 = vld [vmem:[%s2292_s4 + $0x68] sm:$0xff]  ;;  %v1271_v30 = vld [vmem:[%s2292_s4 + $0x70] sm:$0xff] }
 0x250   :  { %491 = vadd.xlane.f32.xlu1 %v490_v38  ;;  %488 = vadd.xlane.f32.xlu0 %v487_v41  ;;  %v1035_v32 = vsel %vm218_vm1, %v1025_v22, 0.0  ;;  %v1032_v37 = vsel %vm218_vm1, %v1024_v23, 0.0  ;;  %v1041_v39 = vsel %vm218_vm1, %v1027_v35, 0.0  ;;  %v1038_v40 = vsel %vm218_vm1, %v1026_v36, 0.0 }
 0x251   :  { %v1047_v47 = vsel %vm218_vm1, %v1029_v43, 0.0  ;;  %v1044_v59 = vsel %vm218_vm1, %v1028_v44, 0.0  ;;  %v1053_v51 = vsel %vm218_vm1, %v1031_v61, 0.0  ;;  %v1050_v52 = vsel %vm218_vm1, %v1030_v48, 0.0  ;;  %v333_v43 = vpop.f32.mrf.mxu1 }
 0x253   :  { %v335_v44 = vpop.f32.mrf.mxu1 }
 0x254   :  { %494 = vadd.xlane.f32.xlu1 %v493_v10  ;;  %497 = vadd.xlane.f32.xlu0 %v496_v11 }
 0x258   :  { %500 = vadd.xlane.f32.xlu1 %v499_v26  ;;  %503 = vadd.xlane.f32.xlu0 %v502_v27 }
 0x25c   :  { %1036 = vadd.xlane.f32.xlu0 %v1035_v32  ;;  %1033 = vadd.xlane.f32.xlu1 %v1032_v37 }
 0x260   :  { %1042 = vadd.xlane.f32.xlu0 %v1041_v39  ;;  %1039 = vadd.xlane.f32.xlu1 %v1038_v40 }
 0x264   :  { %1048 = vadd.xlane.f32.xlu0 %v1047_v47  ;;  %1045 = vadd.xlane.f32.xlu1 %v1044_v59  ;;  %v339_v47 = vpop.f32.mrf.mxu1 }
 0x266   :  { %v341_v59 = vpop.f32.mrf.mxu1 }
 0x268   :  { %1054 = vadd.xlane.f32.xlu0 %v1053_v51  ;;  %1051 = vadd.xlane.f32.xlu1 %v1050_v52  ;;  %v345_v61 = vpop.f32.mrf.mxu1 }
 0x26a   :  { %v347_v48 = vpop.f32.mrf.mxu1 }
 0x26c   :  { %v2007_v51 = vpop.f32.mrf.mxu1 }
 0x26e   :  { %v2009_v52 = vpop.f32.mrf.mxu1 }
 0x279   :  { %215 = vperm.xlu1 %1364, %v54_v55  }
 0x27e   :  { %190 = vperm.xlu0 %1363, %v49_v56  }
 0x281   :  { %v2011_v55 = vpop.f32.mrf.mxu1 }
 0x282   :  { %200 = vperm.xlu0 %1363, %v51_v57  }
 0x283   :  { %v2015_v57 = vpop.f32.mrf.mxu1 }
 0x286   :  { %210 = vperm.xlu0 %1363, %v53_v62  }
 0x2d5   :  { %v486_v4 = vpop.xlane.xlu1 %485  ;;  %v483_v2 = vpop.xlane.xlu0 %482 }
 0x2d6   :  { %v506_v3 = vadd.f32 %v1266_v0, %v486_v4  ;;  %v505_v6 = vadd.f32 %v1265_v1, %v483_v2 }
 0x2d8   :  { %520 = vperm.xlu0 %1363, %v506_v3   ;;  %515 = vperm.xlu1 %1364, %v505_v6   ;;  %v310_v3 = vadd.f32 %v1880_v13, %v1765_v58  ;;  %v312_v6 = vadd.f32 %v1882_v14, %v1765_v58 }
 0x2d9   :  { %v492_v7 = vpop.xlane.xlu1 %491  ;;  %v489_v53 = vpop.xlane.xlu0 %488 }
 0x2da   :  { %v507_v9 = vadd.f32 %v1267_v8, %v489_v53  ;;  %v508_v28 = vadd.f32 %v1268_v45, %v492_v7  ;;  %v318_v7 = vadd.f32 %v1886_v16, %v1769_v60 }
 0x2dc   :  { %525 = vperm.xlu1 %1364, %v507_v9  }
 0x2dd   :  { %v495_v34 = vpop.xlane.xlu1 %494  ;;  %v498_v29 = vpop.xlane.xlu0 %497 }
 0x2de   :  { %v509_v31 = vadd.f32 %v1269_v33, %v495_v34  ;;  %v510_v41 = vadd.f32 %v1270_v24, %v498_v29 }
 0x2e0   :  { %535 = vperm.xlu0 %1363, %v509_v31   ;;  %530 = vperm.xlu1 %1364, %v508_v28  }
 0x2e1   :  { %v501_v25 = vpop.xlane.xlu1 %500  ;;  %v504_v38 = vpop.xlane.xlu0 %503 }
 0x2e2   :  { %v511_v42 = vadd.f32 %v1271_v30, %v501_v25  ;;  %v512_v54 = vadd.f32 %v1272_v46, %v504_v38 }
 0x2e4   :  { %545 = vperm.xlu0 %1363, %v511_v42   ;;  %540 = vperm.xlu1 %1364, %v510_v41   ;;  %v328_v42 = vadd.f32 %v1892_v19, %v1773_v63 }
 0x2e5   :  { %v1034_v49 = vpop.xlane.xlu1 %1033  ;;  %v1037_v50 = vpop.xlane.xlu0 %1036 }
 0x2e6   :  { %v1056_v10 = vadd.f32 %v1265_v1, %v1034_v49  ;;  %v1057_v11 = vadd.f32 %v1266_v0, %v1037_v50  ;;  %v2019_v0 = vpop.f32.mrf.mxu1 }
 0x2e8   :  { %1066 = vperm.xlu0 %1363, %v1056_v10   ;;  %550 = vperm.xlu1 %1364, %v512_v54   ;;  %v2021_v1 = vpop.f32.mrf.mxu1 }
 0x2e9   :  { %v1040_v12 = vpop.xlane.xlu1 %1039  ;;  %v1043_v21 = vpop.xlane.xlu0 %1042 }
 0x2ea   :  { %v1058_v22 = vadd.f32 %v1267_v8, %v1040_v12  ;;  %v1059_v27 = vadd.f32 %v1268_v45, %v1043_v21  ;;  %v316_v8 = vadd.f32 %v1884_v15, %v1769_v60  ;;  %v2035_v53 = vpop.f32.mrf.mxu1 }
 0x2ec   :  { %1076 = vperm.xlu0 %1363, %v1058_v22   ;;  %1071 = vperm.xlu1 %1364, %v1057_v11   ;;  %v2039_v31 = vpop.f32.mrf.mxu1  ;;  %v340_v22 = vadd.f32 %v339_v47, %v1775_v5 }
 0x2ed   :  { %v1046_v23 = vpop.xlane.xlu1 %1045  ;;  %v1049_v26 = vpop.xlane.xlu0 %1048 }
 0x2ee   :  { %v1060_v32 = vadd.f32 %v1269_v33, %v1046_v23  ;;  %v1061_v35 = vadd.f32 %v1270_v24, %v1049_v26 }
 0x2f0   :  { %1086 = vperm.xlu0 %1363, %v1060_v32   ;;  %1081 = vperm.xlu1 %1364, %v1059_v27  }
 0x2f1   :  { %v1052_v37 = vpop.xlane.xlu1 %1051  ;;  %v1055_v39 = vpop.xlane.xlu0 %1054 }
 0x2f2   :  { %v1062_v36 = vadd.f32 %v1271_v30, %v1052_v37  ;;  %v1063_v40 = vadd.f32 %v1272_v46, %v1055_v39  ;;  %v330_v46 = vadd.f32 %v1894_v20, %v1773_v63  ;;  %v342_v20 = vadd.f32 %v341_v59, %v1775_v5 }
 0x2f4   :  { %1096 = vperm.xlu0 %1363, %v1062_v36   ;;  %1091 = vperm.xlu1 %1364, %v1061_v35  }
 0x2f5   :  { %v2023_v4 = vpop.permute.xlu1 %215 }
 0x2f8   :  { %1101 = vperm.xlu1 %1364, %v1063_v40  }
 0x2f9   :  { %v2013_v56 = vpop.permute.xlu0 %190 }
 0x2fa   :  { %v322_v13 = vadd.f32 %v1888_v17, %v2013_v56  ;;  %v324_v15 = vadd.f32 %v1890_v18, %v2013_v56  ;;  %v2047_v17 = vpop.f32.mrf.mxu1 }
 0x2fc   :  { %v2053_v26 = vpop.f32.mrf.mxu1 }
 0x2fd   :  { %v2017_v62 = vpop.permute.xlu0 %200 }
 0x2fe   :  { %v334_v54 = vadd.f32 %v333_v43, %v2017_v62  ;;  %v336_v11 = vadd.f32 %v335_v44, %v2017_v62 }
 0x301   :  { %v2025_v2 = vpop.permute.xlu0 %210 }
 0x302   :  { %v346_v35 = vadd.f32 %v345_v61, %v2025_v2  ;;  %v348_v43 = vadd.f32 %v347_v48, %v2025_v2 }
 0x353   :  { %v516_v9 = vpop.permute.xlu1 %515  ;;  %v521_v45 = vpop.permute.xlu0 %520 }
 0x354   :  { %v553_v33 = vadd.f32 %v516_v9, %v310_v3  ;;  %v554_v34 = vadd.f32 %v516_v9, %v312_v6  ;;  %v555_v29 = vadd.f32 %v521_v45, %v316_v8  ;;  %v556_v28 = vadd.f32 %v521_v45, %v318_v7  ;;  %v2057_v6 = vpop.f32.mrf.mxu1 }
 0x356   :  { %v1283_v14 = vmul.f32 -1.442695, %v553_v33  ;;  %v1284_v24 = vmul.f32 -1.442695, %v554_v34  ;;  %v1285_v30 = vmul.f32 -1.442695, %v555_v29  ;;  %v352_v33 = vadd.f32 %v2007_v51, %v2023_v4 }
 0x357   :  { %v1286_v16 = vmul.f32 -1.442695, %v556_v28  ;;  %v526_v25 = vpop.permute.xlu1 %525  ;;  %v354_v34 = vadd.f32 %v2009_v52, %v2023_v4  ;;  %v2063_v28 = vpop.f32.mrf.mxu1 }
 0x358   :  { %1365 = vpow2.f32 %v1283_v14  ;;  %v557_v38 = vadd.f32 %v526_v25, %v322_v13  ;;  %v558_v41 = vadd.f32 %v526_v25, %v324_v15 }
 0x359   :  { %1367 = vpow2.f32 %v1284_v24 }
 0x35a   :  { %1369 = vpow2.f32 %v1285_v30  ;;  %v1287_v49 = vmul.f32 -1.442695, %v557_v38  ;;  %v1288_v50 = vmul.f32 -1.442695, %v558_v41 }
 0x35b   :  { %1371 = vpow2.f32 %v1286_v16  ;;  %v531_v18 = vpop.permute.xlu1 %530  ;;  %v536_v10 = vpop.permute.xlu0 %535 }
 0x35c   :  { %1373 = vpow2.f32 %v1287_v49  ;;  %v559_v12 = vadd.f32 %v531_v18, %v328_v42  ;;  %v560_v21 = vadd.f32 %v531_v18, %v330_v46  ;;  %v561_v19 = vadd.f32 %v536_v10, %v334_v54  ;;  %v891_v46 = vpop.f32.mrf.mxu1 }
 0x35d   :  { %1375 = vpow2.f32 %v1288_v50  ;;  %v562_v23 = vadd.f32 %v536_v10, %v336_v11  ;;  %v862_v10 = vadd.f32 %v2011_v55, %v1765_v58  ;;  %v864_v11 = vadd.f32 %v2015_v57, %v1765_v58 }
 0x35e   :  { %v1289_v27 = vmul.f32 -1.442695, %v559_v12  ;;  %v1290_v32 = vmul.f32 -1.442695, %v560_v21  ;;  %v1291_v37 = vmul.f32 -1.442695, %v561_v19  ;;  %v868_v19 = vadd.f32 %v2019_v0, %v1769_v60 }
 0x35f   :  { %v1292_v36 = vmul.f32 -1.442695, %v562_v23  ;;  %v541_v39 = vpop.permute.xlu1 %540  ;;  %v546_v40 = vpop.permute.xlu0 %545  ;;  %v2077_v55 = vadd.f32 %v2053_v26, %v1773_v63  ;;  %v2080_v0 = vadd.f32 %v891_v46, %v1775_v5 }
 0x360   :  { %1377 = vpow2.f32 %v1289_v27  ;;  %v563_v44 = vadd.f32 %v541_v39, %v340_v22  ;;  %v564_v3 = vadd.f32 %v541_v39, %v342_v20  ;;  %v565_v47 = vadd.f32 %v546_v40, %v346_v35  ;;  %v893_v20 = vpop.f32.mrf.mxu1 }
 0x361   :  { %1379 = vpow2.f32 %v1290_v32  ;;  %v566_v59 = vadd.f32 %v546_v40, %v348_v43  ;;  %v870_v22 = vadd.f32 %v2021_v1, %v1769_v60  ;;  %v880_v32 = vadd.f32 %v2047_v17, %v1773_v63 }
 0x362   :  { %1381 = vpow2.f32 %v1291_v37  ;;  %v1293_v8 = vmul.f32 -1.442695, %v563_v44  ;;  %v1294_v7 = vmul.f32 -1.442695, %v564_v3  ;;  %v1295_v9 = vmul.f32 -1.442695, %v565_v47 }
 0x363   :  { %1383 = vpow2.f32 %v1292_v36  ;;  %v1296_v45 = vmul.f32 -1.442695, %v566_v59  ;;  %v551_v61 = vpop.permute.xlu1 %550  ;;  %v1067_v41 = vpop.permute.xlu0 %1066  ;;  %v2083_v36 = vadd.f32 %v893_v20, %v1775_v5  ;;  %v874_v43 = vadd.f32 %v2035_v53, %v2013_v56  ;;  %v1498_v20 = vld [vmem:[%s2293_s0 + $0x28] sm:$0xff] }
 0x364   :  { %1385 = vpow2.f32 %v1293_v8  ;;  %v567_v14 = vadd.f32 %v551_v61, %v352_v33  ;;  %v568_v15 = vadd.f32 %v551_v61, %v354_v34  ;;  %v1104_v1 = vadd.f32 %v1067_v41, %v862_v10 }
 0x365   :  { %v1366_v48 = vpop.eup %1365  ;;  %1387 = vpow2.f32 %v1294_v7  ;;  %v1105_v39 = vadd.f32 %v1067_v41, %v864_v11  ;;  %v876_v59 = vadd.f32 %v2039_v31, %v2013_v56  ;;  %v886_v31 = vadd.f32 %v2057_v6, %v2017_v62  ;;  %v1495_v6 = vld [vmem:[%s2293_s0 + $0x10] sm:$0xff]  ;;  %v1497_v11 = vld [vmem:[%s2293_s0 + $0x20] sm:$0xff] }
 0x366   :  { %v1368_v29 = vpop.eup %1367  ;;  %v617_v13 = vadd.f32 1.0, %v1366_v48  ;;  %1389 = vpow2.f32 %v1295_v9  ;;  %v1297_v49 = vmul.f32 -1.442695, %v567_v14  ;;  %v1298_v54 = vmul.f32 -1.442695, %v568_v15  ;;  %v1493_v14 = vld [vmem:[%s2293_s0] sm:$0xff] }
 0x367   :  { %v1370_v24 = vpop.eup %1369  ;;  %v618_v30 = vadd.f32 1.0, %v1368_v29  ;;  %1391 = vpow2.f32 %v1296_v45  ;;  %v1072_v12 = vpop.permute.xlu1 %1071  ;;  %v1325_v9 = vmul.f32 -1.442695, %v1104_v1  ;;  %v1326_v48 = vmul.f32 -1.442695, %v1105_v39  ;;  %v1494_v15 = vld [vmem:[%s2293_s0 + $0x8] sm:$0xff] }
 0x368   :  { %v1372_v16 = vpop.eup %1371  ;;  %1393 = vrcp.f32 %v617_v13  ;;  %v619_v25 = vadd.f32 1.0, %v1370_v24  ;;  %v1077_v57 = vpop.permute.xlu0 %1076  ;;  %v1106_v26 = vadd.f32 %v1072_v12, %v868_v19  ;;  %v1107_v47 = vadd.f32 %v1072_v12, %v870_v22 }
 0x369   :  { %v1374_v38 = vpop.eup %1373  ;;  %1395 = vrcp.f32 %v618_v30  ;;  %v620_v51 = vadd.f32 1.0, %v1372_v16  ;;  %v1108_v45 = vadd.f32 %v1077_v57, %v874_v43  ;;  %v1109_v34 = vadd.f32 %v1077_v57, %v876_v59  ;;  %v897_v13 = vpop.f32.mrf.mxu1 }
 0x36a   :  { %v1376_v42 = vpop.eup %1375  ;;  %1397 = vrcp.f32 %v619_v25  ;;  %v621_v52 = vadd.f32 1.0, %v1374_v38  ;;  %v1327_v56 = vmul.f32 -1.442695, %v1106_v26  ;;  %v1328_v25 = vmul.f32 -1.442695, %v1107_v47 }
 0x36b   :  { %1399 = vrcp.f32 %v620_v51  ;;  %v622_v50 = vadd.f32 1.0, %v1376_v42  ;;  %v1082_v8 = vpop.permute.xlu1 %1081  ;;  %v888_v38 = vadd.f32 %v2063_v28, %v2017_v62  ;;  %v1329_v42 = vmul.f32 -1.442695, %v1108_v45  ;;  %v1496_v62 = vld [vmem:[%s2293_s0 + $0x18] sm:$0xff]  ;;  %v899_v10 = vpop.f32.mrf.mxu1 }
 0x36c   :  { %1401 = vrcp.f32 %v621_v52  ;;  %v1087_v29 = vpop.permute.xlu0 %1086  ;;  %v1110_v46 = vadd.f32 %v1082_v8, %v880_v32  ;;  %v898_v19 = vadd.f32 %v897_v13, %v2025_v2 }
 0x36d   :  { %v1378_v18 = vpop.eup %1377  ;;  %1403 = vrcp.f32 %v622_v50  ;;  %v1111_v50 = vadd.f32 %v1082_v8, %v2077_v55  ;;  %v900_v55 = vadd.f32 %v899_v10, %v2025_v2 }
 0x36e   :  { %v1380_v21 = vpop.eup %1379  ;;  %v623_v23 = vadd.f32 1.0, %v1378_v18  ;;  %1405 = vpow2.f32 %v1297_v49  ;;  %v1330_v49 = vmul.f32 -1.442695, %v1109_v34 }
 0x36f   :  { %v1382_v27 = vpop.eup %1381  ;;  %v624_v58 = vadd.f32 1.0, %v1380_v21  ;;  %1407 = vpow2.f32 %v1298_v54  ;;  %v1092_v54 = vpop.permute.xlu1 %1091  ;;  %v1112_v21 = vadd.f32 %v1087_v29, %v886_v31 }
 0x370   :  { %v1384_v37 = vpop.eup %1383  ;;  %1409 = vrcp.f32 %v623_v23  ;;  %v625_v60 = vadd.f32 1.0, %v1382_v27  ;;  %v1113_v27 = vadd.f32 %v1087_v29, %v888_v38  ;;  %v1097_v32 = vpop.permute.xlu0 %1096  ;;  %v1115_v2 = vadd.f32 %v1092_v54, %v2083_v36 }
 0x371   :  { %v1386_v35 = vpop.eup %1385  ;;  %1411 = vrcp.f32 %v624_v58  ;;  %v626_v17 = vadd.f32 1.0, %v1384_v37  ;;  %v1331_v37 = vmul.f32 -1.442695, %v1110_v46  ;;  %v1333_v43 = vmul.f32 -1.442695, %v1112_v21 }
 0x372   :  { %v1388_v40 = vpop.eup %1387  ;;  %1413 = vrcp.f32 %v625_v60  ;;  %v627_v63 = vadd.f32 1.0, %v1386_v35  ;;  %v1114_v60 = vadd.f32 %v1092_v54, %v2080_v0  ;;  %v1116_v0 = vadd.f32 %v1097_v32, %v898_v19 }
 0x373   :  { %v1390_v44 = vpop.eup %1389  ;;  %1415 = vrcp.f32 %v626_v17  ;;  %v628_v3 = vadd.f32 1.0, %v1388_v40  ;;  %v1332_v17 = vmul.f32 -1.442695, %v1111_v50  ;;  %v903_v40 = vpop.f32.mrf.mxu1  ;;  %v1334_v59 = vmul.f32 -1.442695, %v1113_v27 }
 0x374   :  { %v1392_v5 = vpop.eup %1391  ;;  %1417 = vrcp.f32 %v627_v63  ;;  %v629_v7 = vadd.f32 1.0, %v1390_v44  ;;  %v1499_v63 = vld [vmem:[%s2293_s0 + $0x30] sm:$0xff]  ;;  %v1117_v8 = vadd.f32 %v1097_v32, %v900_v55 }
 0x375   :  { %v1394_v61 = vpop.eup %1393  ;;  %1419 = vrcp.f32 %v628_v3  ;;  %v630_v33 = vadd.f32 1.0, %v1392_v5  ;;  %v1500_v3 = vld [vmem:[%s2293_s0 + $0x38] sm:$0xff]  ;;  %v1501_v5 = vld [vmem:[%s2293_s0 + $0x40] sm:$0xff]  ;;  %v905_v29 = vpop.f32.mrf.mxu1  ;;  %v1507_v32 = vld [vmem:[%s2293_s0 + $0x70] sm:$0xff] }
 0x376   :  { %v1396_v53 = vpop.eup %1395  ;;  %v665_v24 = vmul.f32 %v1493_v14, %v1394_v61  ;;  %1421 = vrcp.f32 %v629_v7  ;;  %v1502_v61 = vld [vmem:[%s2293_s0 + $0x48] sm:$0xff]  ;;  %v1337_v14 = vmul.f32 -1.442695, %v1116_v0 }
 0x377   :  { %v1398_v30 = vpop.eup %1397  ;;  %v666_v16 = vmul.f32 %v1494_v15, %v1396_v53  ;;  %1423 = vrcp.f32 %v630_v33  ;;  %v1503_v53 = vld [vmem:[%s2293_s0 + $0x50] sm:$0xff]  ;;  %v1102_v15 = vpop.permute.xlu1 %1101 }
 0x378   :  { %v1400_v51 = vpop.eup %1399  ;;  %681 = vst [vmem:[%s2297_s5] sm:$0xff] %v665_v24  ;;  %v667_v41 = vmul.f32 %v1495_v6, %v1398_v30  ;;  %1425 = vpow2.f32 %v1325_v9  ;;  %v1335_v9 = vmul.f32 -1.442695, %v1114_v60  ;;  %v1338_v30 = vmul.f32 -1.442695, %v1117_v8 }
 0x379   :  { %v1402_v52 = vpop.eup %1401  ;;  %682 = vst [vmem:[%s2297_s5 + $0x8] sm:$0xff] %v666_v16  ;;  %v668_v28 = vmul.f32 %v1496_v62, %v1400_v51  ;;  %1427 = vpow2.f32 %v1326_v48  ;;  %v1336_v48 = vmul.f32 -1.442695, %v1115_v2  ;;  %v904_v51 = vadd.f32 %v903_v40, %v2023_v4 }
 0x37a   :  { %v1404_v18 = vpop.eup %1403  ;;  %683 = vst [vmem:[%s2297_s5 + $0x10] sm:$0xff] %v667_v41  ;;  %v669_v12 = vmul.f32 %v1497_v11, %v1402_v52  ;;  %1429 = vpow2.f32 %v1327_v56  ;;  %v1504_v56 = vld [vmem:[%s2293_s0 + $0x58] sm:$0xff]  ;;  %v906_v41 = vadd.f32 %v905_v29, %v2023_v4 }
 0x37b   :  { %v1406_v22 = vpop.eup %1405  ;;  %684 = vst [vmem:[%s2297_s5 + $0x18] sm:$0xff] %v668_v28  ;;  %v670_v23 = vmul.f32 %v1498_v20, %v1404_v18  ;;  %1431 = vpow2.f32 %v1328_v25  ;;  %v1505_v25 = vld [vmem:[%s2293_s0 + $0x60] sm:$0xff]  ;;  %v1118_v28 = vadd.f32 %v1102_v15, %v904_v51 }
 0x37c   :  { %v1408_v58 = vpop.eup %1407  ;;  %685 = vst [vmem:[%s2297_s5 + $0x20] sm:$0xff] %v669_v12  ;;  %v631_v57 = vadd.f32 1.0, %v1406_v22  ;;  %1433 = vpow2.f32 %v1329_v42  ;;  %v1506_v42 = vld [vmem:[%s2293_s0 + $0x68] sm:$0xff]  ;;  %v1119_v50 = vadd.f32 %v1102_v15, %v906_v41  ;;  %v1515_v41 = vld [vmem:[%s2293_s0 + $0xb0] sm:$0xff] }
 0x37d   :  { %v1410_v1 = vpop.eup %1409  ;;  %686 = vst [vmem:[%s2297_s5 + $0x28] sm:$0xff] %v670_v23  ;;  %v632_v35 = vadd.f32 1.0, %v1408_v58  ;;  %1435 = vpow2.f32 %v1330_v49  ;;  %v1339_v19 = vmul.f32 -1.442695, %v1118_v28 }
 0x37e   :  { %v1412_v39 = vpop.eup %1411  ;;  %v671_v26 = vmul.f32 %v1499_v63, %v1410_v1  ;;  %1437 = vrcp.f32 %v631_v57  ;;  %v1340_v23 = vmul.f32 -1.442695, %v1119_v50  ;;  %v1508_v57 = vld [vmem:[%s2293_s0 + $0x78] sm:$0xff] }
 0x37f   :  { %v1414_v44 = vpop.eup %1413  ;;  %v672_v47 = vmul.f32 %v1500_v3, %v1412_v39  ;;  %1439 = vrcp.f32 %v632_v35 }
 0x380   :  { %v1416_v36 = vpop.eup %1415  ;;  %687 = vst [vmem:[%s2297_s5 + $0x30] sm:$0xff] %v671_v26  ;;  %v673_v7 = vmul.f32 %v1501_v5, %v1414_v44  ;;  %1441 = vpow2.f32 %v1331_v37  ;;  %v1509_v5 = vld [vmem:[%s2293_s0 + $0x80] sm:$0xff] }
 0x381   :  { %v1418_v45 = vpop.eup %1417  ;;  %688 = vst [vmem:[%s2297_s5 + $0x38] sm:$0xff] %v672_v47  ;;  %v674_v33 = vmul.f32 %v1502_v61, %v1416_v36  ;;  %1443 = vpow2.f32 %v1332_v17 }
 0x382   :  { %v1420_v34 = vpop.eup %1419  ;;  %689 = vst [vmem:[%s2297_s5 + $0x40] sm:$0xff] %v673_v7  ;;  %v675_v13 = vmul.f32 %v1503_v53, %v1418_v45  ;;  %1445 = vpow2.f32 %v1333_v43  ;;  %v1510_v45 = vld [vmem:[%s2293_s0 + $0x88] sm:$0xff]  ;;  %v1512_v53 = vld [vmem:[%s2293_s0 + $0x98] sm:$0xff] }
 0x383   :  { %v1422_v24 = vpop.eup %1421  ;;  %690 = vst [vmem:[%s2297_s5 + $0x48] sm:$0xff] %v674_v33  ;;  %v676_v31 = vmul.f32 %v1504_v56, %v1420_v34  ;;  %1447 = vpow2.f32 %v1334_v59 }
 0x384   :  { %v1424_v16 = vpop.eup %1423  ;;  %691 = vst [vmem:[%s2297_s5 + $0x50] sm:$0xff] %v675_v13  ;;  %v677_v38 = vmul.f32 %v1505_v25, %v1422_v24  ;;  %1449 = vpow2.f32 %v1335_v9  ;;  %v1513_v24 = vld [vmem:[%s2293_s0 + $0xa0] sm:$0xff] }
 0x385   :  { %v1426_v6 = vpop.eup %1425  ;;  %692 = vst [vmem:[%s2297_s5 + $0x58] sm:$0xff] %v676_v31  ;;  %v678_v46 = vmul.f32 %v1506_v42, %v1424_v16  ;;  %1451 = vpow2.f32 %v1336_v48  ;;  %v1511_v48 = vld [vmem:[%s2293_s0 + $0x90] sm:$0xff] }
 0x386   :  { %v1428_v52 = vpop.eup %1427  ;;  %693 = vst [vmem:[%s2297_s5 + $0x60] sm:$0xff] %v677_v38  ;;  %v1168_v62 = vadd.f32 1.0, %v1426_v6  ;;  %1453 = vpow2.f32 %v1337_v14 }
 0x387   :  { %v1430_v49 = vpop.eup %1429  ;;  %694 = vst [vmem:[%s2297_s5 + $0x68] sm:$0xff] %v678_v46  ;;  %v1169_v4 = vadd.f32 1.0, %v1428_v52  ;;  %1455 = vpow2.f32 %v1338_v30  ;;  %v1514_v30 = vld [vmem:[%s2293_s0 + $0xa8] sm:$0xff]  ;;  %v1516_v52 = vld [vmem:[%s2293_s0 + $0xb8] sm:$0xff] }
 0x388   :  { %v1432_v54 = vpop.eup %1431  ;;  %1457 = vrcp.f32 %v1168_v62  ;;  %v1170_v18 = vadd.f32 1.0, %v1430_v49  ;;  %v1517_v49 = vld [vmem:[%s2293_s0 + $0xc0] sm:$0xff] }
 0x389   :  { %v1434_v10 = vpop.eup %1433  ;;  %1459 = vrcp.f32 %v1169_v4  ;;  %v1171_v11 = vadd.f32 1.0, %v1432_v54  ;;  %v1518_v54 = vld [vmem:[%s2293_s0 + $0xc8] sm:$0xff] }
 0x38a   :  { %v1436_v12 = vpop.eup %1435  ;;  %1461 = vrcp.f32 %v1170_v18  ;;  %v1172_v21 = vadd.f32 1.0, %v1434_v10 }
 0x38b   :  { %v1438_v22 = vpop.eup %1437  ;;  %1463 = vrcp.f32 %v1171_v11  ;;  %v1173_v20 = vadd.f32 1.0, %v1436_v12  ;;  %v1519_v11 = vld [vmem:[%s2293_s0 + $0xd0] sm:$0xff] }
 0x38c   :  { %v1440_v27 = vpop.eup %1439  ;;  %v679_v55 = vmul.f32 %v1507_v32, %v1438_v22  ;;  %1465 = vrcp.f32 %v1172_v21  ;;  %v1522_v32 = vld [vmem:[%s2293_s0 + $0xe8] sm:$0xff] }
 0x38d   :  { %v1442_v58 = vpop.eup %1441  ;;  %v680_v37 = vmul.f32 %v1508_v57, %v1440_v27  ;;  %1467 = vrcp.f32 %v1173_v20 }
 0x38e   :  { %v1444_v60 = vpop.eup %1443  ;;  %695 = vst [vmem:[%s2297_s5 + $0x70] sm:$0xff] %v679_v55  ;;  %v1174_v1 = vadd.f32 1.0, %v1442_v58  ;;  %1469 = vpow2.f32 %v1339_v19  ;;  %v1520_v19 = vld [vmem:[%s2293_s0 + $0xd8] sm:$0xff] }
 0x38f   :  { %v1446_v35 = vpop.eup %1445  ;;  %696 = vst [vmem:[%s2297_s5 + $0x78] sm:$0xff] %v680_v37  ;;  %v1175_v17 = vadd.f32 1.0, %v1444_v60  ;;  %1471 = vpow2.f32 %v1340_v23  ;;  %v1521_v23 = vld [vmem:[%s2293_s0 + $0xe0] sm:$0xff]  ;;  %v1523_v37 = vld [vmem:[%s2293_s0 + $0xf0] sm:$0xff] }
 0x390   :  { %v1448_v2 = vpop.eup %1447  ;;  %1473 = vrcp.f32 %v1174_v1  ;;  %v1176_v39 = vadd.f32 1.0, %v1446_v35  ;;  %v1524_v1 = vld [vmem:[%s2293_s0 + $0xf8] sm:$0xff] }
 0x391   :  { %v1450_v40 = vpop.eup %1449  ;;  %1475 = vrcp.f32 %v1175_v17  ;;  %v1177_v63 = vadd.f32 1.0, %v1448_v2 }
 0x392   :  { %v1452_v26 = vpop.eup %1451  ;;  %1477 = vrcp.f32 %v1176_v39  ;;  %v1178_v43 = vadd.f32 1.0, %v1450_v40 }
 0x393   :  { %v1454_v0 = vpop.eup %1453  ;;  %1479 = vrcp.f32 %v1177_v63  ;;  %v1179_v44 = vadd.f32 1.0, %v1452_v26 }
 0x394   :  { %v1456_v3 = vpop.eup %1455  ;;  %1481 = vrcp.f32 %v1178_v43  ;;  %v1180_v47 = vadd.f32 1.0, %v1454_v0 }
 0x395   :  { %v1458_v59 = vpop.eup %1457  ;;  %1483 = vrcp.f32 %v1179_v44  ;;  %v1181_v8 = vadd.f32 1.0, %v1456_v3 }
 0x396   :  { %v1460_v36 = vpop.eup %1459  ;;  %v1216_v7 = vmul.f32 %v1509_v5, %v1458_v59  ;;  %1485 = vrcp.f32 %v1180_v47 }
 0x397   :  { %v1462_v9 = vpop.eup %1461  ;;  %v1217_v61 = vmul.f32 %v1510_v45, %v1460_v36  ;;  %1487 = vrcp.f32 %v1181_v8 }
 0x398   :  { %v1464_v33 = vpop.eup %1463  ;;  %1341 = vst [vmem:[%s2297_s5 + $0x80] sm:$0xff] %v1216_v7  ;;  %v1218_v34 = vmul.f32 %v1511_v48, %v1462_v9 }
 0x399   :  { %v1466_v29 = vpop.eup %1465  ;;  %1342 = vst [vmem:[%s2297_s5 + $0x88] sm:$0xff] %v1217_v61  ;;  %v1219_v13 = vmul.f32 %v1512_v53, %v1464_v33 }
 0x39a   :  { %v1468_v14 = vpop.eup %1467  ;;  %1343 = vst [vmem:[%s2297_s5 + $0x90] sm:$0xff] %v1218_v34  ;;  %v1220_v56 = vmul.f32 %v1513_v24, %v1466_v29 }
 0x39b   :  { %v1470_v31 = vpop.eup %1469  ;;  %1344 = vst [vmem:[%s2297_s5 + $0x98] sm:$0xff] %v1219_v13  ;;  %v1221_v15 = vmul.f32 %v1514_v30, %v1468_v14 }
 0x39c   :  { %v1472_v16 = vpop.eup %1471  ;;  %1345 = vst [vmem:[%s2297_s5 + $0xa0] sm:$0xff] %v1220_v56  ;;  %v1182_v25 = vadd.f32 1.0, %v1470_v31 }
 0x39d   :  { %v1474_v38 = vpop.eup %1473  ;;  %1346 = vst [vmem:[%s2297_s5 + $0xa8] sm:$0xff] %v1221_v15  ;;  %v1183_v51 = vadd.f32 1.0, %v1472_v16 }
 0x39e   :  { %v1476_v6 = vpop.eup %1475  ;;  %v1222_v42 = vmul.f32 %v1515_v41, %v1474_v38  ;;  %1489 = vrcp.f32 %v1182_v25 }
 0x39f   :  { %v1478_v46 = vpop.eup %1477  ;;  %v1223_v62 = vmul.f32 %v1516_v52, %v1476_v6  ;;  %1491 = vrcp.f32 %v1183_v51 }
 0x3a0   :  { %v1480_v28 = vpop.eup %1479  ;;  %1347 = vst [vmem:[%s2297_s5 + $0xb0] sm:$0xff] %v1222_v42  ;;  %v1224_v4 = vmul.f32 %v1517_v49, %v1478_v46 }
 0x3a1   :  { %v1482_v50 = vpop.eup %1481  ;;  %1348 = vst [vmem:[%s2297_s5 + $0xb8] sm:$0xff] %v1223_v62  ;;  %v1225_v18 = vmul.f32 %v1518_v54, %v1480_v28 }
 0x3a2   :  { %v1484_v10 = vpop.eup %1483  ;;  %1349 = vst [vmem:[%s2297_s5 + $0xc0] sm:$0xff] %v1224_v4  ;;  %v1226_v12 = vmul.f32 %v1519_v11, %v1482_v50 }
 0x3a3   :  { %v1486_v21 = vpop.eup %1485  ;;  %1350 = vst [vmem:[%s2297_s5 + $0xc8] sm:$0xff] %v1225_v18  ;;  %v1227_v22 = vmul.f32 %v1520_v19, %v1484_v10 }
 0x3a4   :  { %v1488_v20 = vpop.eup %1487  ;;  %1351 = vst [vmem:[%s2297_s5 + $0xd0] sm:$0xff] %v1226_v12  ;;  %v1228_v27 = vmul.f32 %v1521_v23, %v1486_v21 }
 0x3a5   :  { %1352 = vst [vmem:[%s2297_s5 + $0xd8] sm:$0xff] %v1227_v22  ;;  %v1229_v55 = vmul.f32 %v1522_v32, %v1488_v20 }
 0x3a6   :  { %1353 = vst [vmem:[%s2297_s5 + $0xe0] sm:$0xff] %v1228_v27 }
 0x3a7   :  { %1354 = vst [vmem:[%s2297_s5 + $0xe8] sm:$0xff] %v1229_v55 }
 0x3ab   :  { %v1490_v58 = vpop.eup %1489 }
 0x3ac   :  { %v1492_v57 = vpop.eup %1491  ;;  %v1230_v60 = vmul.f32 %v1523_v37, %v1490_v58 }
 0x3ad   :  { %v1231_v35 = vmul.f32 %v1524_v1, %v1492_v57 }
 0x3ae   :  { %1355 = vst [vmem:[%s2297_s5 + $0xf0] sm:$0xff] %v1230_v60 }
 0x3af   :  { %1356 = vst [vmem:[%s2297_s5 + $0xf8] sm:$0xff] %v1231_v35 }

</bundles_post_ra>
